<compile_context>
chip_gen: v5e
topology: v5e:2x2
jax: 0.10.0
libtpu: 0.0.40
codegen_flags: <defaults>
</compile_context>

<pallas_src>
import math

import jax
import jax.numpy as jnp
from jax.experimental import pallas as pl
from jax.experimental.pallas import tpu as pltpu


def _round_up(x, m):
    return (x + m - 1) // m * m


# ----------------------------------------------------------------------------
# Fused kernel: linear1 -> relu -> linear2 -> relu -> noisy1 -> relu -> noisy2
#               -> per-atom (grouped) softmax, all on one row tile.
# ----------------------------------------------------------------------------
def _fused_mlp_kernel(x_ref, w1_ref, b1_ref, w2_ref, b2_ref, w3_ref, b3_ref,
                      w4_ref, b4_ref, g_ref, o_ref):
    def dense(h_bf16, w_ref, b_ref, relu):
        acc = jnp.dot(h_bf16, w_ref[...], preferred_element_type=jnp.float32)
        acc = acc + b_ref[...]
        if relu:
            acc = jnp.maximum(acc, 0.0)
        return acc

    h = dense(x_ref[...], w1_ref, b1_ref, True).astype(jnp.bfloat16)  # (TM,128)
    h = dense(h, w2_ref, b2_ref, True).astype(jnp.bfloat16)           # (TM,128)
    h = dense(h, w3_ref, b3_ref, True).astype(jnp.bfloat16)           # (TM,512)
    logits = dense(h, w4_ref, b4_ref, False)                          # (TM,AZp) f32

    # Grouped (per-atom-block) softmax, kept lane-dense:
    #  * subtract the row max (any per-group-constant shift cancels exactly in
    #    the ratio; the denom clamp below prevents 0/0 -> NaN if an entire
    #    group were to underflow far below the row max),
    #  * EUP exp in f32, then bf16 so the group-sum matmul takes the bf16 MXU
    #    path; the block-diagonal 0/1 matrix g broadcasts each group's sum to
    #    all of its lanes (pad lanes are singleton groups),
    #  * exact division: numerator and denominator use the same bf16-rounded
    #    exp values, so each distribution sums to 1 to f32 accuracy.
    m = jnp.max(logits, axis=-1, keepdims=True)
    e = jnp.exp(logits - m).astype(jnp.bfloat16)
    denom = jnp.dot(e, g_ref[...], preferred_element_type=jnp.float32)
    denom = jnp.maximum(denom, 1e-30)            # full-group-underflow guard
    o_ref[...] = e.astype(jnp.float32) / denom


def _pick_row_tile(batch):
    # Row (batch) tile heuristic:
    #  * tiny batches: one sublane-aligned tile (16-row multiple for bf16 x),
    #  * mid batches: 256 rows (fills v6e/v7x 256x256 MXU M; keeps >=2 grid
    #    steps above B=256 so both v7x TensorCores get work),
    #  * big batches: 512 rows to amortize per-grid-step overhead.
    # On v5e 128-row tiles already fill the 128x128 MXU M; larger tiles still
    # help there by cutting grid-step count, so one heuristic serves all chips.
    if batch <= 256:
        return _round_up(max(batch, 1), 16)
    if batch <= 2048:
        return 256
    return 512


def forward(prep, x, num_actions, num_atoms):
    """x: (B, num_inputs) -> (B, num_actions, num_atoms) probabilities."""
    B, D = x.shape
    AZ = num_actions * num_atoms
    AZ_pad = prep["w4"].shape[1]
    TM = _pick_row_tile(B)
    grid = (pl.cdiv(B, TM),)

    # Pre-cast activations to bf16 once; no wrapper-side row padding -- Pallas
    # masks the boundary block and rows are independent.
    x_bf = x.astype(jnp.bfloat16)

    def resident(arr):  # whole-array block, resident in VMEM across the grid
        return pl.BlockSpec(arr.shape, lambda i: (0, 0))

    out = pl.pallas_call(
        _fused_mlp_kernel,
        out_shape=jax.ShapeDtypeStruct((B, AZ_pad), jnp.float32),
        grid=grid,
        in_specs=[
            pl.BlockSpec((TM, D), lambda i: (i, 0)),
            resident(prep["w1"]), resident(prep["b1"]),
            resident(prep["w2"]), resident(prep["b2"]),
            resident(prep["w3"]), resident(prep["b3"]),
            resident(prep["w4"]), resident(prep["b4"]),
            resident(prep["g"]),
        ],
        out_specs=pl.BlockSpec((TM, AZ_pad), lambda i: (i, 0)),
        compiler_params=pltpu.CompilerParams(
            dimension_semantics=("parallel",)),
    )(x_bf, prep["w1"], prep["b1"], prep["w2"], prep["b2"],
      prep["w3"], prep["b3"], prep["w4"], prep["b4"], prep["g"])

    # Drop lane padding, expose (actions, atoms).
    return out[:, :AZ].reshape(B, num_actions, num_atoms)


# ----------------------------------------------------------------------------
# Parameter init (matches the PyTorch module) + one-time kernel layout
# ----------------------------------------------------------------------------
def _linear_params(key, in_f, out_f):
    bound = 1.0 / math.sqrt(in_f)
    kw, kb = jax.random.split(key)
    w = jax.random.uniform(kw, (out_f, in_f), minval=-bound, maxval=bound,
                           dtype=jnp.float32)
    b = jax.random.uniform(kb, (out_f,), minval=-bound, maxval=bound,
                           dtype=jnp.float32)
    return w, b


def _noisy_linear_params(key, in_f, out_f, std_init=0.4):
    """Training-mode effective (weight, bias) of NoisyLinear: mu + sigma*eps."""
    mu_range = 1.0 / math.sqrt(in_f)
    k1, k2, k3, k4, k5 = jax.random.split(key, 5)
    w_mu = jax.random.uniform(k1, (out_f, in_f), minval=-mu_range,
                              maxval=mu_range, dtype=jnp.float32)
    b_mu = jax.random.uniform(k2, (out_f,), minval=-mu_range,
                              maxval=mu_range, dtype=jnp.float32)
    w_sigma = jnp.full((out_f, in_f), std_init / math.sqrt(in_f), jnp.float32)
    b_sigma = jnp.full((out_f,), std_init / math.sqrt(out_f), jnp.float32)

    def scale_noise(k, n):
        v = jax.random.normal(k, (n,), jnp.float32)
        return jnp.sign(v) * jnp.sqrt(jnp.abs(v))

    eps_in = scale_noise(k3, in_f)
    eps_out = scale_noise(k4, out_f)
    w_eps = jnp.outer(eps_out, eps_in)
    b_eps = scale_noise(k5, out_f)
    return w_mu + w_sigma * w_eps, b_mu + b_sigma * b_eps


def init_params(key, num_inputs, num_actions, num_atoms, std_init=0.4):
    k1, k2, k3, k4 = jax.random.split(key, 4)
    l1_w, l1_b = _linear_params(k1, num_inputs, 128)
    l2_w, l2_b = _linear_params(k2, 128, 128)
    n1_w, n1_b = _noisy_linear_params(k3, 128, 512, std_init)
    n2_w, n2_b = _noisy_linear_params(k4, 512, num_actions * num_atoms, std_init)
    return dict(l1_w=l1_w, l1_b=l1_b, l2_w=l2_w, l2_b=l2_b,
                n1_w=n1_w, n1_b=n1_b, n2_w=n2_w, n2_b=n2_b)


def prepare_params(params, num_actions, num_atoms):
    """One-time kernel layout:
      * weights (out,in) -> (K,N) bf16 for the MXU; the final layer's N
        (= num_actions*num_atoms) is zero-padded up to a multiple of 128 so
        the 4th matmul and the output stores are lane-dense,
      * biases as (1,N) f32 rows (final bias zero-padded to match),
      * block-diagonal bf16 grouping matrix for the fused softmax epilogue;
        pad lanes form singleton groups so they never pollute real sums.
    """
    AZ = num_actions * num_atoms
    AZ_pad = _round_up(AZ, 128)

    def wk(w, n_pad=None):
        w = jnp.asarray(w, jnp.float32).T                  # (K, N)
        if n_pad is not None and n_pad > w.shape[1]:
            w = jnp.pad(w, ((0, 0), (0, n_pad - w.shape[1])))
        return w.astype(jnp.bfloat16)

    def bk(b, n_pad=None):
        b = jnp.asarray(b, jnp.float32).reshape(1, -1)
        if n_pad is not None and n_pad > b.shape[1]:
            b = jnp.pad(b, ((0, 0), (0, n_pad - b.shape[1])))
        return b

    lane = jnp.arange(AZ_pad)
    gid = jnp.where(lane < AZ, lane // num_atoms, num_actions + lane)
    # TODO(synk): for large distributional heads (AZ >> 128) replace this
    # O(AZ^2) block-diagonal matrix with a (AZ,A)x(A,AZ) two-sided pair or a
    # reshape-based segment sum to avoid quadratic VMEM/compute.
    g = (gid[:, None] == gid[None, :]).astype(jnp.bfloat16)

    return dict(
        w1=wk(params["l1_w"]), b1=bk(params["l1_b"]),
        w2=wk(params["l2_w"]), b2=bk(params["l2_b"]),
        w3=wk(params["n1_w"]), b3=bk(params["n1_b"]),
        w4=wk(params["n2_w"], AZ_pad), b4=bk(params["n2_b"], AZ_pad),
        g=g,
    )


# ----------------------------------------------------------------------------
# Pure-JAX f32 reference (PyTorch forward semantics)
# ----------------------------------------------------------------------------
def reference_forward(params, x, num_actions, num_atoms):
    x = x.astype(jnp.float32)
    h = jax.nn.relu(x @ params["l1_w"].T + params["l1_b"])
    h = jax.nn.relu(h @ params["l2_w"].T + params["l2_b"])
    h = jax.nn.relu(h @ params["n1_w"].T + params["n1_b"])
    logits = h @ params["n2_w"].T + params["n2_b"]
    p = jax.nn.softmax(logits.reshape(-1, num_atoms), axis=-1)
    return p.reshape(-1, num_actions, num_atoms)


# ----------------------------------------------------------------------------
if __name__ == "__main__":
    num_inputs = 32
    num_actions = 4
    num_atoms = 8
    batch = 2

    key = jax.random.PRNGKey(0)
    kp, kx = jax.random.split(key)
    params = init_params(kp, num_inputs, num_actions, num_atoms)
    prep = prepare_params(params, num_actions, num_atoms)
    x = jax.random.normal(kx, (batch, num_inputs), dtype=jnp.float32)

    out = jax.block_until_ready(forward(prep, x, num_actions, num_atoms))

    assert out.shape == (batch, num_actions, num_atoms), out.shape
    assert bool(jnp.all(jnp.isfinite(out)))
    # exact division -> per-atom distributions sum to 1 to f32 accuracy
    assert bool(jnp.allclose(jnp.sum(out, axis=-1), 1.0, atol=1e-3)), \
        float(jnp.max(jnp.abs(jnp.sum(out, axis=-1) - 1.0)))
    # cross-check vs f32 reference (kernel uses bf16 MXU operands)
    ref = jax.block_until_ready(
        reference_forward(params, x, num_actions, num_atoms))
    assert bool(jnp.allclose(out, ref, atol=3e-2, rtol=1e-1)), \
        float(jnp.max(jnp.abs(out - ref)))

    print("KERNEL_OK")
</pallas_src>

<mosaic_0001>
module attributes {stable_mosaic.version = 11 : i64} {
  func.func @_fused_mlp_kernel(%arg0: i32, %arg1: memref<16x32xbf16, #tpu.memory_space<vmem>>, %arg2: memref<32x128xbf16, #tpu.memory_space<vmem>>, %arg3: memref<1x128xf32, #tpu.memory_space<vmem>>, %arg4: memref<128x128xbf16, #tpu.memory_space<vmem>>, %arg5: memref<1x128xf32, #tpu.memory_space<vmem>>, %arg6: memref<128x512xbf16, #tpu.memory_space<vmem>>, %arg7: memref<1x512xf32, #tpu.memory_space<vmem>>, %arg8: memref<512x128xbf16, #tpu.memory_space<vmem>>, %arg9: memref<1x128xf32, #tpu.memory_space<vmem>>, %arg10: memref<128x128xbf16, #tpu.memory_space<vmem>>, %arg11: memref<16x128xf32, #tpu.memory_space<vmem>>) attributes {dimension_semantics = [#tpu.dimension_semantics<parallel>], iteration_bounds = array<i64: 1>, scalar_prefetch = 0 : i64, scratch_operands = 0 : i64, tpu.core_type = #tpu.core_type<tc>, window_params = [{transform_indices = @transform_0, window_bounds = array<i64: 16, 32>}, {pipeline_mode = #tpu.pipeline_mode<synchronous>, transform_indices = @transform_1, window_bounds = array<i64: 32, 128>}, {pipeline_mode = #tpu.pipeline_mode<synchronous>, transform_indices = @transform_2, window_bounds = array<i64: 1, 128>}, {pipeline_mode = #tpu.pipeline_mode<synchronous>, transform_indices = @transform_3, window_bounds = array<i64: 128, 128>}, {pipeline_mode = #tpu.pipeline_mode<synchronous>, transform_indices = @transform_4, window_bounds = array<i64: 1, 128>}, {pipeline_mode = #tpu.pipeline_mode<synchronous>, transform_indices = @transform_5, window_bounds = array<i64: 128, 512>}, {pipeline_mode = #tpu.pipeline_mode<synchronous>, transform_indices = @transform_6, window_bounds = array<i64: 1, 512>}, {pipeline_mode = #tpu.pipeline_mode<synchronous>, transform_indices = @transform_7, window_bounds = array<i64: 512, 128>}, {pipeline_mode = #tpu.pipeline_mode<synchronous>, transform_indices = @transform_8, window_bounds = array<i64: 1, 128>}, {pipeline_mode = #tpu.pipeline_mode<synchronous>, transform_indices = @transform_9, window_bounds = array<i64: 128, 128>}, {transform_indices = @transform_10, window_bounds = array<i64: 16, 128>}]} {
    %c0 = arith.constant 0 : index
    %c0_0 = arith.constant 0 : index
    %0 = vector.load %arg1[%c0, %c0_0] : memref<16x32xbf16, #tpu.memory_space<vmem>>, vector<16x32xbf16>
    %c0_1 = arith.constant 0 : index
    %c0_2 = arith.constant 0 : index
    %1 = vector.load %arg2[%c0_1, %c0_2] : memref<32x128xbf16, #tpu.memory_space<vmem>>, vector<32x128xbf16>
    %cst = arith.constant dense<0.000000e+00> : vector<16x128xf32>
    %2 = tpu.matmul %0, %1, %cst {dimension_numbers = #tpu.dot_dimension_numbers<[1], [0], [0], [1], [0, 0, 1, 1], [], []>} : vector<16x32xbf16>, vector<32x128xbf16>, vector<16x128xf32> -> vector<16x128xf32>
    %c0_3 = arith.constant 0 : index
    %c0_4 = arith.constant 0 : index
    %3 = vector.load %arg3[%c0_3, %c0_4] : memref<1x128xf32, #tpu.memory_space<vmem>>, vector<1x128xf32>
    %4 = vector.broadcast %3 : vector<1x128xf32> to vector<16x128xf32>
    %5 = arith.addf %2, %4 : vector<16x128xf32>
    %cst_5 = arith.constant 0.000000e+00 : f32
    %6 = vector.broadcast %cst_5 : f32 to vector<16x128xf32>
    %7 = arith.maximumf %5, %6 : vector<16x128xf32>
    %8 = arith.truncf %7 : vector<16x128xf32> to vector<16x128xbf16>
    %c0_6 = arith.constant 0 : index
    %c0_7 = arith.constant 0 : index
    %9 = vector.load %arg4[%c0_6, %c0_7] : memref<128x128xbf16, #tpu.memory_space<vmem>>, vector<128x128xbf16>
    %cst_8 = arith.constant dense<0.000000e+00> : vector<16x128xf32>
    %10 = tpu.matmul %8, %9, %cst_8 {dimension_numbers = #tpu.dot_dimension_numbers<[1], [0], [0], [1], [0, 0, 1, 1], [], []>} : vector<16x128xbf16>, vector<128x128xbf16>, vector<16x128xf32> -> vector<16x128xf32>
    %c0_9 = arith.constant 0 : index
    %c0_10 = arith.constant 0 : index
    %11 = vector.load %arg5[%c0_9, %c0_10] : memref<1x128xf32, #tpu.memory_space<vmem>>, vector<1x128xf32>
    %12 = vector.broadcast %11 : vector<1x128xf32> to vector<16x128xf32>
    %13 = arith.addf %10, %12 : vector<16x128xf32>
    %cst_11 = arith.constant 0.000000e+00 : f32
    %14 = vector.broadcast %cst_11 : f32 to vector<16x128xf32>
    %15 = arith.maximumf %13, %14 : vector<16x128xf32>
    %16 = arith.truncf %15 : vector<16x128xf32> to vector<16x128xbf16>
    %c0_12 = arith.constant 0 : index
    %c0_13 = arith.constant 0 : index
    %17 = vector.load %arg6[%c0_12, %c0_13] : memref<128x512xbf16, #tpu.memory_space<vmem>>, vector<128x512xbf16>
    %cst_14 = arith.constant dense<0.000000e+00> : vector<16x512xf32>
    %18 = tpu.matmul %16, %17, %cst_14 {dimension_numbers = #tpu.dot_dimension_numbers<[1], [0], [0], [1], [0, 0, 1, 1], [], []>} : vector<16x128xbf16>, vector<128x512xbf16>, vector<16x512xf32> -> vector<16x512xf32>
    %c0_15 = arith.constant 0 : index
    %c0_16 = arith.constant 0 : index
    %19 = vector.load %arg7[%c0_15, %c0_16] : memref<1x512xf32, #tpu.memory_space<vmem>>, vector<1x512xf32>
    %20 = vector.broadcast %19 : vector<1x512xf32> to vector<16x512xf32>
    %21 = arith.addf %18, %20 : vector<16x512xf32>
    %cst_17 = arith.constant 0.000000e+00 : f32
    %22 = vector.broadcast %cst_17 : f32 to vector<16x512xf32>
    %23 = arith.maximumf %21, %22 : vector<16x512xf32>
    %24 = arith.truncf %23 : vector<16x512xf32> to vector<16x512xbf16>
    %c0_18 = arith.constant 0 : index
    %c0_19 = arith.constant 0 : index
    %25 = vector.load %arg8[%c0_18, %c0_19] : memref<512x128xbf16, #tpu.memory_space<vmem>>, vector<512x128xbf16>
    %cst_20 = arith.constant dense<0.000000e+00> : vector<16x128xf32>
    %26 = tpu.matmul %24, %25, %cst_20 {dimension_numbers = #tpu.dot_dimension_numbers<[1], [0], [0], [1], [0, 0, 1, 1], [], []>} : vector<16x512xbf16>, vector<512x128xbf16>, vector<16x128xf32> -> vector<16x128xf32>
    %c0_21 = arith.constant 0 : index
    %c0_22 = arith.constant 0 : index
    %27 = vector.load %arg9[%c0_21, %c0_22] : memref<1x128xf32, #tpu.memory_space<vmem>>, vector<1x128xf32>
    %28 = vector.broadcast %27 : vector<1x128xf32> to vector<16x128xf32>
    %29 = arith.addf %26, %28 : vector<16x128xf32>
    %cst_23 = arith.constant dense<0xFF800000> : vector<16xf32>
    %30 = vector.multi_reduction <maximumf>, %29, %cst_23 [1] : vector<16x128xf32> to vector<16xf32>
    %31 = vector.shape_cast %30 : vector<16xf32> to vector<16x1xf32>
    %32 = vector.broadcast %31 : vector<16x1xf32> to vector<16x128xf32>
    %33 = arith.subf %29, %32 : vector<16x128xf32>
    %34 = math.exp %33 : vector<16x128xf32>
    %35 = arith.truncf %34 : vector<16x128xf32> to vector<16x128xbf16>
    %c0_24 = arith.constant 0 : index
    %c0_25 = arith.constant 0 : index
    %36 = vector.load %arg10[%c0_24, %c0_25] : memref<128x128xbf16, #tpu.memory_space<vmem>>, vector<128x128xbf16>
    %cst_26 = arith.constant dense<0.000000e+00> : vector<16x128xf32>
    %37 = tpu.matmul %35, %36, %cst_26 {dimension_numbers = #tpu.dot_dimension_numbers<[1], [0], [0], [1], [0, 0, 1, 1], [], []>} : vector<16x128xbf16>, vector<128x128xbf16>, vector<16x128xf32> -> vector<16x128xf32>
    %cst_27 = arith.constant 1.000000e-30 : f32
    %38 = vector.broadcast %cst_27 : f32 to vector<16x128xf32>
    %39 = arith.maximumf %37, %38 : vector<16x128xf32>
    %40 = arith.extf %35 : vector<16x128xbf16> to vector<16x128xf32>
    %41 = arith.divf %40, %39 : vector<16x128xf32>
    %c0_28 = arith.constant 0 : index
    %c0_29 = arith.constant 0 : index
    %42 = vector.load %arg11[%c0_28, %c0_29] : memref<16x128xf32, #tpu.memory_space<vmem>>, vector<16x128xf32>
    tpu.vector_store %arg11[%c0_28, %c0_29], %41 {strides = array<i32>} : memref<16x128xf32, #tpu.memory_space<vmem>>, vector<16x128xf32>,
    return
  }
  func.func @transform_0(%arg0: i32) -> (i32, i32) {
    %c0_i32 = arith.constant 0 : i32
    %c0_i32_0 = arith.constant 0 : i32
    return %arg0, %c0_i32 : i32, i32
  }
  func.func @transform_1(%arg0: i32) -> (i32, i32) {
    %c0_i32 = arith.constant 0 : i32
    %c0_i32_0 = arith.constant 0 : i32
    %c0_i32_1 = arith.constant 0 : i32
    return %c0_i32, %c0_i32_0 : i32, i32
  }
  func.func @transform_2(%arg0: i32) -> (i32, i32) {
    %c0_i32 = arith.constant 0 : i32
    %c0_i32_0 = arith.constant 0 : i32
    %c0_i32_1 = arith.constant 0 : i32
    return %c0_i32, %c0_i32_0 : i32, i32
  }
  func.func @transform_3(%arg0: i32) -> (i32, i32) {
    %c0_i32 = arith.constant 0 : i32
    %c0_i32_0 = arith.constant 0 : i32
    %c0_i32_1 = arith.constant 0 : i32
    return %c0_i32, %c0_i32_0 : i32, i32
  }
  func.func @transform_4(%arg0: i32) -> (i32, i32) {
    %c0_i32 = arith.constant 0 : i32
    %c0_i32_0 = arith.constant 0 : i32
    %c0_i32_1 = arith.constant 0 : i32
    return %c0_i32, %c0_i32_0 : i32, i32
  }
  func.func @transform_5(%arg0: i32) -> (i32, i32) {
    %c0_i32 = arith.constant 0 : i32
    %c0_i32_0 = arith.constant 0 : i32
    %c0_i32_1 = arith.constant 0 : i32
    return %c0_i32, %c0_i32_0 : i32, i32
  }
  func.func @transform_6(%arg0: i32) -> (i32, i32) {
    %c0_i32 = arith.constant 0 : i32
    %c0_i32_0 = arith.constant 0 : i32
    %c0_i32_1 = arith.constant 0 : i32
    return %c0_i32, %c0_i32_0 : i32, i32
  }
  func.func @transform_7(%arg0: i32) -> (i32, i32) {
    %c0_i32 = arith.constant 0 : i32
    %c0_i32_0 = arith.constant 0 : i32
    %c0_i32_1 = arith.constant 0 : i32
    return %c0_i32, %c0_i32_0 : i32, i32
  }
  func.func @transform_8(%arg0: i32) -> (i32, i32) {
    %c0_i32 = arith.constant 0 : i32
    %c0_i32_0 = arith.constant 0 : i32
    %c0_i32_1 = arith.constant 0 : i32
    return %c0_i32, %c0_i32_0 : i32, i32
  }
  func.func @transform_9(%arg0: i32) -> (i32, i32) {
    %c0_i32 = arith.constant 0 : i32
    %c0_i32_0 = arith.constant 0 : i32
    %c0_i32_1 = arith.constant 0 : i32
    return %c0_i32, %c0_i32_0 : i32, i32
  }
  func.func @transform_10(%arg0: i32) -> (i32, i32) {
    %c0_i32 = arith.constant 0 : i32
    %c0_i32_0 = arith.constant 0 : i32
    return %arg0, %c0_i32 : i32, i32
  }
}

</mosaic_0001>

<bundles_post_ra>
// kernel: tpu_custom_call.1
= control target key start
LH: loop header
LB: loop body
LE: loop exit
PB: predicated region body
PF: predicated region fallthrough
CT: control target
= control target key end

     0   :  { %15 = vsyncpa [#allocation3], 0  ;;  %s1795_s0 = inlined_call_operand.hbm [shape: bf16[2,32], index: 0, kind: input, shape index: {}]   ;;  %s1796_s1 = inlined_call_operand.hbm [shape: bf16[32,128], index: 1, kind: input, shape index: {}]   ;;  %s1797_s2 = inlined_call_operand.vmem [shape: f32[1,128], index: 2, kind: input, shape index: {}]   ;;  %s1798_s3 = inlined_call_operand.hbm [shape: bf16[128,128], index: 3, kind: input, shape index: {}]   ;;  %s1799_s4 = inlined_call_operand.hbm [shape: f32[1,128], index: 4, kind: input, shape index: {}]   ;;  %s1800_s5 = inlined_call_operand.hbm [shape: bf16[128,512], index: 5, kind: input, shape index: {}]   ;;  %s1801_s6 = inlined_call_operand.vmem [shape: f32[1,512], index: 6, kind: input, shape index: {}]   ;;  %s1802_s7 = inlined_call_operand.hbm [shape: bf16[512,128], index: 7, kind: input, shape index: {}]   ;;  %s1803_s8 = inlined_call_operand.vmem [shape: f32[1,128], index: 8, kind: input, shape index: {}]   ;;  %s1804_s9 = inlined_call_operand.hbm [shape: bf16[128,128], index: 9, kind: input, shape index: {}]   ;;  %s1805_s10 = inlined_call_operand.hbm [shape: f32[2,128], index: 10, kind: output, shape index: {}]  }
   0x1   :  { %16 = vsyncpa [#allocation6], 0 }
   0x2   :  { %17 = vsyncpa [#allocation9], 0 }
   0x3   :  { %18 = vsyncpa [#allocation12], 0 }
   0x4   :  { %19 = vsyncpa [#allocation4], 0  ;;  %s37_s15 = sshll.u32 %s1796_s1, 4  ;;  %s38_s15 = int_to_ptr.hbm [resolvable:$true] %s37_s15 }
   0x5   :  { %23 = vsyncadd [#allocation3], 112  ;;  %s1680_s16 = smov [#allocation5]   ;;  %s66_s20 = sshll.u32 %s1799_s4, 4  ;;  %s67_s20 = int_to_ptr.hbm [resolvable:$true] %s66_s20 }
   0x6   :  { %s39_s17 = sshll.u32 %s1680_s16, 4  ;;  %s1681_s21 = smov 64   ;;  %s40_s17 = int_to_ptr.vmem [resolvable:$true] %s39_s17 }
   0x7   :  { %s1682_s22 = smov 4   ;;  %s1683_s23 = smov [#allocation8]  }
   0x8   :  { %45 = dma.hbm_to_vmem [thread:$0]  %s38_s15, 256, %s40_s17, [#allocation6], %s1681_s21, %s1681_s21, %s1682_s22  }
   0x9   :  { %s68_s24 = sshll.u32 %s1683_s23, 4  ;;  %s91_s26 = sshll.u32 %s1802_s7, 4  ;;  %s69_s24 = int_to_ptr.vmem [resolvable:$true] %s68_s24  ;;  %s92_s26 = int_to_ptr.hbm [resolvable:$true] %s91_s26 }
   0xa   :  { %71 = dma.hbm_to_vmem [thread:$0]  %s67_s20, 16, %s69_s24, [#allocation9]  }
   0xb   :  { %s24_s4 = sshll.u32 %s1795_s0, 4  ;;  %s1684_s29 = smov [#allocation11]   ;;  %s25_s4 = int_to_ptr.hbm [resolvable:$true] %s24_s4 }
   0xc   :  { %s93_s30 = sshll.u32 %s1684_s29, 4  ;;  %s1685_s11 = smov [#allocation2]   ;;  %s94_s30 = int_to_ptr.vmem [resolvable:$true] %s93_s30 }
   0xd   :  { %99 = dma.hbm_to_vmem [thread:$0]  %s92_s26, 4096, %s94_s30, [#allocation12], %s1681_s21, %s1681_s21, %s1682_s22  }
   0xe   :  { %s26_s12 = sshll.u32 %s1685_s11, 4  ;;  %s1686_s13 = smov 16   ;;  %s27_s12 = int_to_ptr.vmem [resolvable:$true] %s26_s12 }
   0xf   :  { %s1687_s7 = smov 1   ;;  %s52_s16 = sshll.u32 %s1798_s3, 4  ;;  %s53_s16 = int_to_ptr.hbm [resolvable:$true] %s52_s16 }
  0x10   :  { %32 = dma.hbm_to_vmem [thread:$0]  %s25_s4, 16, %s27_s12, [#allocation3], %s1686_s13, %s1686_s13, %s1687_s7  }
  0x11   :  { %s1688_s0 = smov [#allocation7]   ;;  %s76_s20 = sshll.u32 %s1800_s5, 4  ;;  %s77_s20 = int_to_ptr.hbm [resolvable:$true] %s76_s20 }
  0x12   :  { %s54_s17 = sshll.u32 %s1688_s0, 4  ;;  %s1689_s23 = smov [#allocation10]   ;;  %s55_s17 = int_to_ptr.vmem [resolvable:$true] %s54_s17 }
  0x13   :  { %60 = dma.hbm_to_vmem [thread:$0]  %s53_s16, 1024, %s55_s17, [#allocation6], %s1681_s21, %s1681_s21, %s1682_s22  }
  0x14   :  { %s78_s24 = sshll.u32 %s1689_s23, 4  ;;  %s106_s3 = sshll.u32 %s1804_s9, 4  ;;  %s79_s24 = int_to_ptr.vmem [resolvable:$true] %s78_s24  ;;  %s107_s3 = int_to_ptr.hbm [resolvable:$true] %s106_s3 }
  0x15   :  { %s1690_s26 = smov 256   ;;  %s1691_s27 = smov [#allocation13]  }
  0x16   :  { %84 = dma.hbm_to_vmem [thread:$0]  %s77_s20, 4096, %s79_s24, [#allocation9], %s1690_s26, %s1690_s26, %s1686_s13  }
  0x17   :  { %s108_s28 = sshll.u32 %s1691_s27, 4  ;;  %s109_s28 = int_to_ptr.vmem [resolvable:$true] %s108_s28 }
  0x18   :  { %114 = dma.hbm_to_vmem [thread:$0]  %s107_s3, 1024, %s109_s28, [#allocation12], %s1681_s21, %s1681_s21, %s1682_s22  }
  0x19   :  { %1670 = dma.done.wait [#allocation3], 128  }
  0x1a   :  { %1671 = vsyncadd [#allocation3], 4294967168 }
  0x1b   :  { %1672 = dma.done.wait [#allocation6], 1280  }
  0x1c   :  { %1673 = vsyncadd [#allocation6], 4294966016 }
  0x1d   :  { %1674 = dma.done.wait [#allocation9], 4112  }
  0x1e   :  { %1675 = vsyncadd [#allocation9], 4294963184 }
  0x1f   :  { %1676 = dma.done.wait [#allocation12], 5120  }
  0x20   :  { %1677 = vsyncadd [#allocation12], 4294962176  ;;  %v1371_v0 = vld [vmem:[#allocation5 + $0x8] sm:$0xff]  ;;  %v144_v1 = vld [vmem:[#allocation2] sm:$0x1]  ;;  %vm196_vm0 = vcmask 261120  }
  0x21   :  { %v145_v2 = vld [vmem:[#allocation2 + $0x1] sm:$0x1]  ;;  %205 = vmatpush.bf16.msra.mxu0 %v1371_v0  ;;  %v1370_v3 = vld [vmem:[#allocation5] sm:$0xff]  ;;  %v146_v4 = vld [vmem:[#allocation2 + $0x2] sm:$0x1] }
  0x22   :  { %v147_v5 = vld [vmem:[#allocation2 + $0x3] sm:$0x1]  ;;  %v148_v6 = vld [vmem:[#allocation2 + $0x4] sm:$0x1]  ;;  %161 = vst [vmem:[#allocation1] ss:$9 sm:$0xff] %v144_v1 }
  0x23   :  { %v1379_v7 = vld [vmem:[#allocation7 + $0x38] sm:$0xff]  ;;  %v149_v8 = vld [vmem:[#allocation2 + $0x5] sm:$0x1]  ;;  %164 = vst [vmem:[#allocation1 + $0x1] ss:$9 sm:$0xff] %v145_v2  ;;  %v1378_v9 = vld [vmem:[#allocation7 + $0x30] sm:$0xff] }
  0x24   :  { %167 = vst [vmem:[#allocation1 + $0x2] ss:$9 sm:$0xff] %v146_v4  ;;  %284 = vmatpush.bf16.msra.mxu1 %v1379_v7  ;;  %v150_v10 = vld [vmem:[#allocation2 + $0x6] sm:$0x1]  ;;  %v151_v11 = vld [vmem:[#allocation2 + $0x7] sm:$0x1] }
  0x25   :  { %206 = vmatpush.bf16.msra.mxu0 %v1370_v3  ;;  %170 = vst [vmem:[#allocation1 + $0x3] ss:$9 sm:$0xff] %v147_v5  ;;  %v1377_v12 = vld [vmem:[#allocation7 + $0x28] sm:$0xff]  ;;  %v1376_v13 = vld [vmem:[#allocation7 + $0x20] sm:$0xff]  ;;  %v1375_v15 = vld [vmem:[#allocation7 + $0x18] sm:$0xff] }
  0x26   :  { %173 = vst [vmem:[#allocation1 + $0x4] ss:$9 sm:$0xff] %v148_v6  ;;  %v1374_v16 = vld [vmem:[#allocation7 + $0x10] sm:$0xff]  ;;  %v1373_v17 = vld [vmem:[#allocation7 + $0x8] sm:$0xff]  ;;  %v1372_v18 = vld [vmem:[#allocation7] sm:$0xff] }
  0x27   :  { %176 = vst [vmem:[#allocation1 + $0x5] ss:$9 sm:$0xff] %v149_v8  ;;  %v1196_v19 = vld [vmem:[#allocation10 + $0xe0] sm:$0xf]  ;;  %v1410_v20 = vld [vmem:[#allocation10 + $0xec] sm:$0xf0] }
  0x28   :  { %179 = vst [vmem:[#allocation1 + $0x6] ss:$9 sm:$0xff] %v150_v10  ;;  %285 = vmatpush.bf16.msra.mxu1 %v1378_v9  ;;  %v1408_v21 = vld [vmem:[#allocation10 + $0xe4] sm:$0xf]  ;;  %v1197_v22 = vor.u32 %v1410_v20, %v1196_v19  ;;  %v1198_v23 = vld [vmem:[#allocation10 + $0xf0] sm:$0xf0] }
  0x29   :  { %182 = vst [vmem:[#allocation1 + $0x7] ss:$9 sm:$0xff] %v151_v11  ;;  %v1204_v24 = vld [vmem:[#allocation10 + $0xe8] sm:$0xf]  ;;  %v1411_v25 = vld [vmem:[#allocation10 + $0xf4] sm:$0xf0]  ;;  %v1201_v26 = vor.u32 %v1408_v21, %v1198_v23 }
  0x2a   :  { %v1205_v27 = vor.u32 %v1411_v25, %v1204_v24  ;;  %v1409_v28 = vld [vmem:[#allocation10 + $0xec] sm:$0xf]  ;;  %v1206_v29 = vld [vmem:[#allocation10 + $0xf8] sm:$0xf0]  ;;  %v1180_v30 = vld [vmem:[#allocation10 + $0xc0] sm:$0xf]  ;;  %503 = vmatpush.bf16.msra.mxu2 %v1197_v22 }
  0x2b   :  { %v1209_v31 = vor.u32 %v1409_v28, %v1206_v29  ;;  %v1406_v32 = vld [vmem:[#allocation10 + $0xcc] sm:$0xf0]  ;;  %v1404_v33 = vld [vmem:[#allocation10 + $0xc4] sm:$0xf]  ;;  %v1182_v34 = vld [vmem:[#allocation10 + $0xd0] sm:$0xf0]  ;;  %517 = vmatpush.bf16.msra.mxu3 %v1201_v26 }
  0x2c   :  { %286 = vmatpush.bf16.msra.mxu1 %v1377_v12  ;;  %531 = vmatpush.bf16.msrb.mxu0 %v1205_v27  ;;  %v1181_v35 = vor.u32 %v1406_v32, %v1180_v30  ;;  %v1185_v36 = vor.u32 %v1404_v33, %v1182_v34  ;;  %v1188_v37 = vld [vmem:[#allocation10 + $0xc8] sm:$0xf]  ;;  %v1407_v38 = vld [vmem:[#allocation10 + $0xd4] sm:$0xf0]  ;;  %v1405_v39 = vld [vmem:[#allocation10 + $0xcc] sm:$0xf] }
  0x2d   :  { %v1189_v40 = vor.u32 %v1407_v38, %v1188_v37  ;;  %v1190_v41 = vld [vmem:[#allocation10 + $0xd8] sm:$0xf0]  ;;  %v1164_v42 = vld [vmem:[#allocation10 + $0xa0] sm:$0xf]  ;;  %v1402_v43 = vld [vmem:[#allocation10 + $0xac] sm:$0xf0] }
  0x2e   :  { %v1193_v44 = vor.u32 %v1405_v39, %v1190_v41  ;;  %v1400_v45 = vld [vmem:[#allocation10 + $0xa4] sm:$0xf]  ;;  %v1166_v46 = vld [vmem:[#allocation10 + $0xb0] sm:$0xf0]  ;;  %v1172_v47 = vld [vmem:[#allocation10 + $0xa8] sm:$0xf]  ;;  %504 = vmatpush.bf16.msra.mxu2 %v1181_v35  ;;  %v1165_v48 = vor.u32 %v1402_v43, %v1164_v42 }
  0x2f   :  { %v1403_v49 = vld [vmem:[#allocation10 + $0xb4] sm:$0xf0]  ;;  %v1401_v50 = vld [vmem:[#allocation10 + $0xac] sm:$0xf]  ;;  %v1174_v51 = vld [vmem:[#allocation10 + $0xb8] sm:$0xf0]  ;;  %518 = vmatpush.bf16.msra.mxu3 %v1185_v36  ;;  %v1169_v52 = vor.u32 %v1400_v45, %v1166_v46 }
  0x30   :  { %v183_v14 = vld [vmem:[#allocation1] sm:$0xff]  ;;  %287 = vmatpush.bf16.msra.mxu1 %v1376_v13  ;;  %532 = vmatpush.bf16.msrb.mxu0 %v1189_v40  ;;  %v1173_v53 = vor.u32 %v1403_v49, %v1172_v47  ;;  %v1398_v55 = vld [vmem:[#allocation10 + $0x8c] sm:$0xf0]  ;;  %v1177_v57 = vor.u32 %v1401_v50, %v1174_v51  ;;  %v1150_v58 = vld [vmem:[#allocation10 + $0x90] sm:$0xf0] }
  0x31   :  { %1049 = vmatmul.msk.bf16.vlgmr.msra.gmra.mxu0 %vm196_vm0, %v183_v14  ;;  %v1148_v54 = vld [vmem:[#allocation10 + $0x80] sm:$0xf]  ;;  %v1396_v56 = vld [vmem:[#allocation10 + $0x84] sm:$0xf]  ;;  %v1156_v59 = vld [vmem:[#allocation10 + $0x88] sm:$0xf] }
  0x32   :  { %v1399_v60 = vld [vmem:[#allocation10 + $0x94] sm:$0xf0]  ;;  %v1397_v61 = vld [vmem:[#allocation10 + $0x8c] sm:$0xf]  ;;  %v1158_v62 = vld [vmem:[#allocation10 + $0x98] sm:$0xf0]  ;;  %505 = vmatpush.bf16.msra.mxu2 %v1165_v48  ;;  %v1149_v63 = vor.u32 %v1398_v55, %v1148_v54  ;;  %v1153_v0 = vor.u32 %v1396_v56, %v1150_v58 }
  0x33   :  { %519 = vmatpush.bf16.msra.mxu3 %v1169_v52  ;;  %v1157_v1 = vor.u32 %v1399_v60, %v1156_v59  ;;  %v1161_v2 = vor.u32 %v1397_v61, %v1158_v62  ;;  %v1467_v4 = vld [vmem:[%s1797_s2] ss:$0 sm:$0xff]  ;;  %v1132_v11 = vld [vmem:[#allocation10 + $0x60] sm:$0xf]  ;;  %v1394_v12 = vld [vmem:[#allocation10 + $0x6c] sm:$0xf0] }
  0x34   :  { %288 = vmatpush.bf16.msra.mxu1 %v1375_v15  ;;  %533 = vmatpush.bf16.msrb.mxu0 %v1173_v53  ;;  %v1392_v13 = vld [vmem:[#allocation10 + $0x64] sm:$0xf]  ;;  %v1133_v14 = vor.u32 %v1394_v12, %v1132_v11  ;;  %v1134_v15 = vld [vmem:[#allocation10 + $0x70] sm:$0xf0]  ;;  %v1393_v20 = vld [vmem:[#allocation10 + $0x6c] sm:$0xf] }
  0x35   :  { %v1142_v21 = vld [vmem:[#allocation10 + $0x78] sm:$0xf0]  ;;  %v1116_v23 = vld [vmem:[#allocation10 + $0x40] sm:$0xf]  ;;  %v1390_v24 = vld [vmem:[#allocation10 + $0x4c] sm:$0xf0] }
  0x36   :  { %506 = vmatpush.bf16.msra.mxu2 %v1149_v63  ;;  %v1145_v22 = vor.u32 %v1393_v20, %v1142_v21  ;;  %v1388_v25 = vld [vmem:[#allocation10 + $0x44] sm:$0xf]  ;;  %v1117_v26 = vor.u32 %v1390_v24, %v1116_v23  ;;  %v1118_v27 = vld [vmem:[#allocation10 + $0x50] sm:$0xf0]  ;;  %v1124_v28 = vld [vmem:[#allocation10 + $0x48] sm:$0xf] }
  0x37   :  { %520 = vmatpush.bf16.msra.mxu3 %v1153_v0  ;;  %v1391_v29 = vld [vmem:[#allocation10 + $0x54] sm:$0xf0]  ;;  %v1121_v30 = vor.u32 %v1388_v25, %v1118_v27  ;;  %v1389_v32 = vld [vmem:[#allocation10 + $0x4c] sm:$0xf]  ;;  %v1126_v33 = vld [vmem:[#allocation10 + $0x58] sm:$0xf0] }
  0x38   :  { %289 = vmatpush.bf16.msra.mxu1 %v1374_v16  ;;  %534 = vmatpush.bf16.msrb.mxu0 %v1157_v1  ;;  %v1140_v16 = vld [vmem:[#allocation10 + $0x68] sm:$0xf]  ;;  %v1129_v34 = vor.u32 %v1389_v32, %v1126_v33  ;;  %v1100_v35 = vld [vmem:[#allocation10 + $0x20] sm:$0xf]  ;;  %v1386_v36 = vld [vmem:[#allocation10 + $0x2c] sm:$0xf0] }
  0x39   :  { %v1384_v37 = vld [vmem:[#allocation10 + $0x24] sm:$0xf]  ;;  %v1101_v38 = vor.u32 %v1386_v36, %v1100_v35  ;;  %v1102_v39 = vld [vmem:[#allocation10 + $0x30] sm:$0xf0]  ;;  %v1108_v40 = vld [vmem:[#allocation10 + $0x28] sm:$0xf] }
  0x3a   :  { %507 = vmatpush.bf16.msra.mxu2 %v1133_v14  ;;  %v1387_v41 = vld [vmem:[#allocation10 + $0x34] sm:$0xf0]  ;;  %v1105_v42 = vor.u32 %v1384_v37, %v1102_v39  ;;  %v1110_v45 = vld [vmem:[#allocation10 + $0x38] sm:$0xf0]  ;;  %v1084_v47 = vld [vmem:[#allocation10] sm:$0xf] }
  0x3b   :  { %v1109_v43 = vor.u32 %v1387_v41, %v1108_v40  ;;  %v1382_v48 = vld [vmem:[#allocation10 + $0xc] sm:$0xf0]  ;;  %v1380_v49 = vld [vmem:[#allocation10 + $0x4] sm:$0xf]  ;;  %v1086_v51 = vld [vmem:[#allocation10 + $0x10] sm:$0xf0] }
  0x3c   :  { %290 = vmatpush.bf16.msra.mxu1 %v1373_v17  ;;  %v1395_v17 = vld [vmem:[#allocation10 + $0x74] sm:$0xf0]  ;;  %v1085_v50 = vor.u32 %v1382_v48, %v1084_v47  ;;  %v1092_v52 = vld [vmem:[#allocation10 + $0x8] sm:$0xf]  ;;  %v1089_v54 = vor.u32 %v1380_v49, %v1086_v51  ;;  %v1381_v56 = vld [vmem:[#allocation10 + $0xc] sm:$0xf] }
  0x3d   :  { %v1141_v19 = vor.u32 %v1395_v17, %v1140_v16  ;;  %v1383_v53 = vld [vmem:[#allocation10 + $0x14] sm:$0xf0]  ;;  %v1434_v63 = vld [vmem:[#allocation11 + $0xb0] sm:$0xff]  ;;  %v1424_v20 = vld [vmem:[#allocation11 + $0x60] sm:$0xff] }
  0x3e   :  { %508 = vmatpush.bf16.msra.mxu2 %v1117_v26  ;;  %v1093_v55 = vor.u32 %v1383_v53, %v1092_v52  ;;  %v1435_v59 = vld [vmem:[#allocation11 + $0xb8] sm:$0xff]  ;;  %v1442_v0 = vld [vmem:[#allocation11 + $0xf0] sm:$0xff]  ;;  %v1429_v25 = vld [vmem:[#allocation11 + $0x88] sm:$0xff] }
  0x3f   :  { %535 = vmatpush.bf16.msrb.mxu0 %v1141_v19  ;;  %v1443_v60 = vld [vmem:[#allocation11 + $0xf8] sm:$0xff]  ;;  %v1418_v1 = vld [vmem:[#allocation11 + $0x30] sm:$0xff]  ;;  %v1416_v19 = vld [vmem:[#allocation11 + $0x20] sm:$0xff] }
  0x40   :  { %291 = vmatpush.bf16.msra.mxu1 %v1372_v18  ;;  %v1137_v18 = vor.u32 %v1392_v13, %v1134_v15  ;;  %v1419_v61 = vld [vmem:[#allocation11 + $0x38] sm:$0xff]  ;;  %v1430_v21 = vld [vmem:[#allocation11 + $0x90] sm:$0xff]  ;;  %v1437_v26 = vld [vmem:[#allocation11 + $0xc8] sm:$0xff] }
  0x41   :  { %v1427_v62 = vld [vmem:[#allocation11 + $0x78] sm:$0xff]  ;;  %v1414_v27 = vld [vmem:[#allocation11 + $0x10] sm:$0xff]  ;;  %v1421_v32 = vld [vmem:[#allocation11 + $0x48] sm:$0xff] }
  0x42   :  { %521 = vmatpush.bf16.msra.mxu3 %v1137_v18  ;;  %509 = vmatpush.bf16.msra.mxu2 %v1101_v38  ;;  %v1431_v17 = vld [vmem:[#allocation11 + $0x98] sm:$0xff]  ;;  %v1412_v33 = vld [vmem:[#allocation11] sm:$0xff] }
  0x43   :  { %v1439_v18 = vld [vmem:[#allocation11 + $0xd8] sm:$0xff] }
  0x44   :  { %545 = vmatpush.bf16.msrb.mxu1 %v1209_v31  ;;  %v1125_v31 = vor.u32 %v1391_v29, %v1124_v28  ;;  %v1415_v23 = vld [vmem:[#allocation11 + $0x18] sm:$0xff]  ;;  %v1422_v28 = vld [vmem:[#allocation11 + $0x50] sm:$0xff]  ;;  %v1428_v29 = vld [vmem:[#allocation11 + $0x80] sm:$0xff] }
  0x45   :  { %v1423_v24 = vld [vmem:[#allocation11 + $0x58] sm:$0xff] }
  0x46   :  { %522 = vmatpush.bf16.msra.mxu3 %v1121_v30  ;;  %536 = vmatpush.bf16.msrb.mxu0 %v1125_v31  ;;  %v1436_v30 = vld [vmem:[#allocation11 + $0xc0] sm:$0xff]  ;;  %v1413_v31 = vld [vmem:[#allocation11 + $0x8] sm:$0xff] }
  0x47   :  { %510 = vmatpush.bf16.msra.mxu2 %v1085_v50  ;;  %v333_v35 = vld [vmem:[%s1801_s6] sm:$0xf] }
  0x48   :  { %546 = vmatpush.bf16.msrb.mxu1 %v1193_v44  ;;  %v1385_v44 = vld [vmem:[#allocation10 + $0x2c] sm:$0xf]  ;;  %v337_v38 = vperm.slane %v333_v35, 2  ;;  %v338_v39 = vperm.slane %v333_v35, 3 }
  0x49   :  { %v1113_v46 = vor.u32 %v1385_v44, %v1110_v45  ;;  %v335_v44 = vperm.slane %v333_v35, 0  ;;  %v336_v45 = vperm.slane %v333_v35, 1 }
  0x4a   :  { %523 = vmatpush.bf16.msra.mxu3 %v1105_v42  ;;  %537 = vmatpush.bf16.msrb.mxu0 %v1109_v43 }
  0x4b   :  { %831 = vmatpush.bf16.msrb.mxu2 %v1419_v61 }
  0x4c   :  { %547 = vmatpush.bf16.msrb.mxu1 %v1177_v57  ;;  %v1094_v57 = vld [vmem:[#allocation10 + $0x18] sm:$0xf0] }
  0x4d   :  { %v1097_v58 = vor.u32 %v1381_v56, %v1094_v57 }
  0x4e   :  { %524 = vmatpush.bf16.msra.mxu3 %v1089_v54  ;;  %538 = vmatpush.bf16.msrb.mxu0 %v1093_v55 }
  0x4f   :  { %832 = vmatpush.bf16.msrb.mxu2 %v1418_v1 }
  0x50   :  { %548 = vmatpush.bf16.msrb.mxu1 %v1161_v2  ;;  %v1426_v2 = vld [vmem:[#allocation11 + $0x70] sm:$0xff] }
  0x52   :  { %859 = vmatpush.bf16.msra.mxu0 %v1435_v59  ;;  %845 = vmatpush.bf16.msrb.mxu3 %v1427_v62 }
  0x54   :  { %549 = vmatpush.bf16.msrb.mxu1 %v1145_v22  ;;  %v1438_v22 = vld [vmem:[#allocation11 + $0xd0] sm:$0xff] }
  0x56   :  { %860 = vmatpush.bf16.msra.mxu0 %v1434_v63  ;;  %846 = vmatpush.bf16.msrb.mxu3 %v1426_v2 }
  0x58   :  { %550 = vmatpush.bf16.msrb.mxu1 %v1129_v34  ;;  %v1420_v34 = vld [vmem:[#allocation11 + $0x40] sm:$0xff] }
  0x5c   :  { %551 = vmatpush.bf16.msrb.mxu1 %v1113_v46 }
  0x60   :  { %552 = vmatpush.bf16.msrb.mxu1 %v1097_v58 }
  0xae   :  { %v208_v3 = vpop.f32.mrf.mxu0 }
  0xaf   :  { %v209_v5 = vadd.f32 %v1467_v4, %v208_v3  ;;  %v1433_v3 = vld [vmem:[#allocation11 + $0xa8] sm:$0xff] }
  0xb0   :  { %861 = vmatpush.bf16.msra.mxu0 %v1433_v3 }
  0xb1   :  { %v213_v8 = vmax.f32 %v209_v5, 0.0  ;;  %v1417_v5 = vld [vmem:[#allocation11 + $0x28] sm:$0xff] }
  0xb2   :  { %833 = vmatpush.bf16.msrb.mxu2 %v1417_v5  ;;  %v1450_v5 = vld [vmem:[#allocation13 + $0x30] sm:$0xff] }
  0xb6   :  { %v210_v6 = vpop.f32.mrf.mxu0  ;;  %834 = vmatpush.bf16.msrb.mxu2 %v1416_v19 }
  0xb7   :  { %v211_v7 = vadd.f32 %v1467_v4, %v210_v6  ;;  %v1441_v4 = vld [vmem:[#allocation11 + $0xe8] sm:$0xff] }
  0xb8   :  { %v1425_v6 = vld [vmem:[#allocation11 + $0x68] sm:$0xff] }
  0xb9   :  { %v214_v9 = vmax.f32 %v211_v7, 0.0  ;;  %v1432_v7 = vld [vmem:[#allocation11 + $0xa0] sm:$0xff]  ;;  %847 = vmatpush.bf16.msrb.mxu3 %v1425_v6  ;;  %v1469_v6 = vld [vmem:[%s1803_s8] ss:$0 sm:$0xff] }
  0xba   :  { %862 = vmatpush.bf16.msra.mxu0 %v1432_v7  ;;  %835 = vmatpush.bf16.msrb.mxu2 %v1415_v23  ;;  %v1449_v23 = vld [vmem:[#allocation13 + $0x28] sm:$0xff] }
  0xbb   :  { %v215_v10 = vpack.c.bf16 %v214_v9, %v213_v8  ;;  %v1440_v8 = vld [vmem:[#allocation11 + $0xe0] sm:$0xff] }
  0xbd   :  { %292 = vmatmul.bf16.vlgmr.msra.gmra.mxu1 %v215_v10  ;;  %v1468_v10 = vld [vmem:[#allocation8] ss:$0 sm:$0xff]  ;;  %848 = vmatpush.bf16.msrb.mxu3 %v1424_v20 }
  0xbe   :  { %873 = vmatpush.bf16.msra.mxu1 %v1443_v60  ;;  %863 = vmatpush.bf16.msra.mxu0 %v1431_v17 }
  0xbf   :  { %836 = vmatpush.bf16.msrb.mxu2 %v1414_v27  ;;  %v1445_v27 = vld [vmem:[#allocation13 + $0x8] sm:$0xff] }
  0xc1   :  { %849 = vmatpush.bf16.msrb.mxu3 %v1423_v24  ;;  %v1448_v24 = vld [vmem:[#allocation13 + $0x20] sm:$0xff] }
  0xc2   :  { %874 = vmatpush.bf16.msra.mxu1 %v1442_v0  ;;  %864 = vmatpush.bf16.msra.mxu0 %v1430_v21 }
  0xc3   :  { %837 = vmatpush.bf16.msrb.mxu2 %v1413_v31 }
  0xc5   :  { %850 = vmatpush.bf16.msrb.mxu3 %v1422_v28  ;;  %v1444_v28 = vld [vmem:[#allocation13] sm:$0xff] }
  0xc6   :  { %875 = vmatpush.bf16.msra.mxu1 %v1441_v4  ;;  %865 = vmatpush.bf16.msra.mxu0 %v1429_v25  ;;  %v1451_v4 = vld [vmem:[#allocation13 + $0x38] sm:$0xff] }
  0xc7   :  { %838 = vmatpush.bf16.msrb.mxu2 %v1412_v33  ;;  %v1447_v25 = vld [vmem:[#allocation13 + $0x18] sm:$0xff] }
  0xc9   :  { %851 = vmatpush.bf16.msrb.mxu3 %v1421_v32 }
  0xca   :  { %876 = vmatpush.bf16.msra.mxu1 %v1440_v8  ;;  %866 = vmatpush.bf16.msra.mxu0 %v1428_v29 }
  0xcd   :  { %852 = vmatpush.bf16.msrb.mxu3 %v1420_v34 }
  0xce   :  { %877 = vmatpush.bf16.msra.mxu1 %v1439_v18 }
  0xd2   :  { %878 = vmatpush.bf16.msra.mxu1 %v1438_v22 }
  0xd6   :  { %879 = vmatpush.bf16.msra.mxu1 %v1437_v26  ;;  %v1446_v26 = vld [vmem:[#allocation13 + $0x10] sm:$0xff] }
  0xda   :  { %880 = vmatpush.bf16.msra.mxu1 %v1436_v30 }
 0x13a   :  { %v293_v9 = vpop.f32.mrf.mxu1 }
 0x13b   :  { %v294_v11 = vadd.f32 %v1468_v10, %v293_v9 }
 0x13d   :  { %v298_v14 = vmax.f32 %v294_v11, 0.0 }
 0x142   :  { %v295_v12 = vpop.f32.mrf.mxu1 }
 0x143   :  { %v296_v13 = vadd.f32 %v1468_v10, %v295_v12 }
 0x145   :  { %v299_v15 = vmax.f32 %v296_v13, 0.0 }
 0x147   :  { %v300_v16 = vpack.c.bf16 %v299_v15, %v298_v14 }
 0x149   :  { %511 = vmatmul.bf16.vlgmr.msra.gmra.mxu2 %v300_v16  ;;  %525 = vmatmul.bf16.vlgmr.msra.gmra.mxu3 %v300_v16 }
 0x14a   :  { %539 = vmatmul.bf16.vlgmr.msrb.gmra.mxu0 %v300_v16  ;;  %553 = vmatmul.bf16.vlgmr.msrb.gmra.mxu1 %v300_v16 }
 0x14b   :  { %969 = vmatpush.bf16.msra.mxu2 %v1451_v4 }
 0x14f   :  { %970 = vmatpush.bf16.msra.mxu2 %v1450_v5 }
 0x153   :  { %971 = vmatpush.bf16.msra.mxu2 %v1449_v23 }
 0x157   :  { %972 = vmatpush.bf16.msra.mxu2 %v1448_v24 }
 0x15b   :  { %973 = vmatpush.bf16.msra.mxu2 %v1447_v25 }
 0x15f   :  { %974 = vmatpush.bf16.msra.mxu2 %v1446_v26 }
 0x163   :  { %975 = vmatpush.bf16.msra.mxu2 %v1445_v27 }
 0x167   :  { %976 = vmatpush.bf16.msra.mxu2 %v1444_v28 }
 0x1c7   :  { %v540_v36 = vpop.f32.mrf.mxu0  ;;  %v554_v37 = vpop.f32.mrf.mxu1 }
 0x1c8   :  { %v541_v42 = vadd.f32 %v540_v36, %v337_v38  ;;  %v555_v43 = vadd.f32 %v554_v37, %v338_v39 }
 0x1ca   :  { %v561_v50 = vmax.f32 %v541_v42, 0.0  ;;  %v562_v51 = vmax.f32 %v555_v43, 0.0 }
 0x1cc   :  { %v512_v40 = vpop.f32.mrf.mxu2  ;;  %v526_v41 = vpop.f32.mrf.mxu3 }
 0x1cd   :  { %v513_v54 = vadd.f32 %v512_v40, %v335_v44  ;;  %v527_v55 = vadd.f32 %v526_v41, %v336_v45 }
 0x1cf   :  { %v542_v46 = vpop.f32.mrf.mxu0  ;;  %v556_v47 = vpop.f32.mrf.mxu1  ;;  %v559_v62 = vmax.f32 %v513_v54, 0.0  ;;  %v560_v63 = vmax.f32 %v527_v55, 0.0 }
 0x1d0   :  { %v543_v48 = vadd.f32 %v542_v46, %v337_v38  ;;  %v557_v49 = vadd.f32 %v556_v47, %v338_v39 }
 0x1d2   :  { %v565_v52 = vmax.f32 %v543_v48, 0.0  ;;  %v566_v53 = vmax.f32 %v557_v49, 0.0 }
 0x1d4   :  { %v569_v56 = vpack.c.bf16 %v565_v52, %v561_v50  ;;  %v570_v57 = vpack.c.bf16 %v566_v53, %v562_v51  ;;  %v514_v58 = vpop.f32.mrf.mxu2  ;;  %v528_v59 = vpop.f32.mrf.mxu3 }
 0x1d5   :  { %v515_v60 = vadd.f32 %v514_v58, %v335_v44  ;;  %v529_v61 = vadd.f32 %v528_v59, %v336_v45 }
 0x1d6   :  { %867 = vmatmul.bf16.vlgmr.msra.gmra.mxu0 %v569_v56  ;;  %881 = vmatmul.bf16.vlgmr.msra.gmra.mxu1 %v570_v57 }
 0x1d7   :  { %v563_v0 = vmax.f32 %v515_v60, 0.0  ;;  %v564_v1 = vmax.f32 %v529_v61, 0.0 }
 0x1d9   :  { %v567_v2 = vpack.c.bf16 %v563_v0, %v559_v62  ;;  %v568_v3 = vpack.c.bf16 %v564_v1, %v560_v63 }
 0x1db   :  { %839 = vmatmul.bf16.vlgmr.msrb.gmra.mxu2 %v567_v2  ;;  %853 = vmatmul.bf16.vlgmr.msrb.gmra.mxu3 %v568_v3 }
 0x253   :  { %v868_v10 = vpop.f32.mrf.mxu0  ;;  %v882_v12 = vpop.f32.mrf.mxu1 }
 0x25b   :  { %v870_v19 = vpop.f32.mrf.mxu0  ;;  %v884_v21 = vpop.f32.mrf.mxu1 }
 0x25e   :  { %v840_v7 = vpop.f32.mrf.mxu2  ;;  %v854_v8 = vpop.f32.mrf.mxu3 }
 0x25f   :  { %v841_v9 = vadd.f32 %v1469_v6, %v840_v7 }
 0x261   :  { %v855_v11 = vadd.f32 %v854_v8, %v841_v9 }
 0x263   :  { %v869_v13 = vadd.f32 %v868_v10, %v855_v11 }
 0x265   :  { %v883_v14 = vadd.f32 %v882_v12, %v869_v13 }
 0x266   :  { %v842_v15 = vpop.f32.mrf.mxu2  ;;  %v856_v17 = vpop.f32.mrf.mxu3 }
 0x267   :  { %v843_v16 = vadd.f32 %v1469_v6, %v842_v15  ;;  %887 = vmax.xlane.f32.xlu0 %v883_v14 }
 0x269   :  { %v857_v18 = vadd.f32 %v856_v17, %v843_v16 }
 0x26b   :  { %v871_v20 = vadd.f32 %v870_v19, %v857_v18 }
 0x26d   :  { %v885_v22 = vadd.f32 %v884_v21, %v871_v20 }
 0x26f   :  { %889 = vmax.xlane.f32.xlu0 %v885_v22 }
 0x2da   :  { %v888_v29 = vpop.xlane.xlu0 %887 }
 0x2db   :  { %v891_v30 = vsub.f32 %v883_v14, %v888_v29 }
 0x2dd   :  { %v893_v31 = vmul.f32 1.442695, %v891_v30 }
 0x2df   :  { %1470 = vpow2.f32 %v893_v31 }
 0x2e2   :  { %v890_v32 = vpop.xlane.xlu0 %889 }
 0x2e3   :  { %v892_v33 = vsub.f32 %v885_v22, %v890_v32 }
 0x2e5   :  { %v895_v34 = vmul.f32 1.442695, %v892_v33  ;;  %v1471_v35 = vpop.eup %1470 }
 0x2e6   :  { %v897_v36 = vpack.c.bf16 %v1471_v35, %v1471_v35 }
 0x2e7   :  { %1472 = vpow2.f32 %v895_v34 }
 0x2e8   :  { %v917_v39 = vunpack.c.l.b16 %v897_v36  ;;  %v985_v55 = vunpack.c.l.bf16 %v897_v36 }
 0x2ed   :  { %v1473_v37 = vpop.eup %1472 }
 0x2ee   :  { %v898_v38 = vpack.c.bf16 %v1473_v37, %v1473_v37 }
 0x2f0   :  { %v918_v40 = vunpack.c.l.b16 %v898_v38  ;;  %v986_v2 = vunpack.c.l.bf16 %v898_v38 }
 0x2f2   :  { %v919_v41 = vpack.c.b16 %v918_v40, %v917_v39 }
 0x2f4   :  { %977 = vmatmul.bf16.vlgmr.msra.gmra.mxu2 %v919_v41 }
 0x377   :  { %v978_v42 = vpop.f32.mrf.mxu2 }
 0x378   :  { %v983_v43 = vmax.f32 %v978_v42, 1e-30 }
 0x37a   :  { %1474 = vrcp.f32 %v983_v43  ;;  %v998_v49 = vand.u32 2147483648, %v983_v43  ;;  %v996_v51 = vand.u32 2147483647, %v983_v43  ;;  %vm992_vm2 = vweird.f32 %v983_v43 }
 0x37c   :  { %v999_v54 = vor.u32 1.1754944e-38, %v998_v49  ;;  %vm997_vm4 = vcmp.eq.f32.partialorder %v996_v51, 8.507059e+37 }
 0x37f   :  { %v980_v44 = vpop.f32.mrf.mxu2 }
 0x380   :  { %v1475_v45 = vpop.eup %1474  ;;  %v984_v46 = vmax.f32 %v980_v44, 1e-30 }
 0x381   :  { %v988_v47 = vmul.f32 %v1475_v45, %v983_v43  ;;  %vm993_vm1 = vweird.f32 %v1475_v45 }
 0x382   :  { %1476 = vrcp.f32 %v984_v46  ;;  %vm994_vm3 = vmor %vm992_vm2, %vm993_vm1  ;;  %v1013_v61 = vand.u32 2147483648, %v984_v46  ;;  %v1011_v63 = vand.u32 2147483647, %v984_v46  ;;  %vm1007_vm6 = vweird.f32 %v984_v46 }
 0x383   :  { %v989_v48 = vsub.f32 1.0, %v988_v47 }
 0x384   :  { %v1014_v1 = vor.u32 1.1754944e-38, %v1013_v61  ;;  %vm1012_vm8 = vcmp.eq.f32.partialorder %v1011_v63, 8.507059e+37 }
 0x385   :  { %v990_v50 = vmul.f32 %v1475_v45, %v989_v48 }
 0x387   :  { %v991_v52 = vadd.f32 %v1475_v45, %v990_v50 }
 0x388   :  { %v1477_v53 = vpop.eup %1476 }
 0x389   :  { %v995_v56 = vsel %vm994_vm3, %v1475_v45, %v991_v52  ;;  %v1003_v57 = vmul.f32 %v1477_v53, %v984_v46  ;;  %vm1008_vm5 = vweird.f32 %v1477_v53 }
 0x38a   :  { %v1000_v58 = vsel %vm997_vm4, %v999_v54, %v995_v56  ;;  %vm1009_vm7 = vmor %vm1007_vm6, %vm1008_vm5 }
 0x38b   :  { %v1001_v59 = vmul.f32 %v1000_v58, %v985_v55  ;;  %v1004_v60 = vsub.f32 1.0, %v1003_v57 }
 0x38d   :  { %1017 = vst [vmem:[#allocation14] sm:$0xff] %v1001_v59  ;;  %v1005_v62 = vmul.f32 %v1477_v53, %v1004_v60 }
 0x38f   :  { %v1006_v0 = vadd.f32 %v1477_v53, %v1005_v62 }
 0x391   :  { %v1010_v3 = vsel %vm1009_vm7, %v1477_v53, %v1006_v0 }
 0x392   :  { %v1015_v4 = vsel %vm1012_vm8, %v1014_v1, %v1010_v3 }
 0x393   :  { %v1016_v5 = vmul.f32 %v1015_v4, %v986_v2 }
 0x395   :  { %1018 = vst [vmem:[#allocation14 + $0x8] sm:$0xff] %v1016_v5 }
 0x396   :  { %1022 = vsyncadd [#allocation4], 224  ;;  %s1025_s29 = sshll.u32 %s1805_s10, 4  ;;  %s1692_s30 = smov [#allocation14]   ;;  %s1026_s29 = int_to_ptr.hbm [resolvable:$true] %s1025_s29 }
 0x397   :  { %s1023_s11 = sshll.u32 %s1692_s30, 4  ;;  %s1693_s12 = smov 32   ;;  %s1024_s11 = int_to_ptr.vmem [resolvable:$true] %s1023_s11 }
 0x398   :  { %s1694_s13 = smov 2  }
 0x399   :  { %1031 = dma.vmem_to_hbm [thread:$0]  %s1024_s11, 32, %s1026_s29, [#allocation4], %s1693_s12, %s1693_s12, %s1694_s13  }
 0x39a   :  { %1678 = dma.done.wait [#allocation4], 256  }
 0x39b   :  { %1679 = vsyncadd [#allocation4], 4294967040 }
 0x39c   :  { %1036 = vsyncpa [#allocation3], 1 }
 0x39d   :  { %1037 = vsyncpa [#allocation6], 1 }
 0x39e   :  { %1038 = vsyncpa [#allocation9], 1 }
 0x39f   :  { %1039 = vsyncpa [#allocation12], 1 }
 0x3a0   :  { %1040 = vsyncpa [#allocation4], 1 }

</bundles_post_ra>
